<compile_context>
chip_gen: v6e
topology: v6e:2x2x1
jax: 0.10.0
libtpu: 0.0.40
codegen_flags: <defaults>
</compile_context>

<pallas_src>
import jax
import jax.numpy as jnp
from jax.experimental import pallas as pl
from jax.experimental.pallas import tpu as pltpu

B = 2            # batch
N = 8            # sequence length
DIM = 32         # model dim
HEADS = 4
DIM_HEAD = 8
INNER = HEADS * DIM_HEAD          # 32
SCALE = DIM_HEAD ** (-0.5)
S = B * N                         # rows fed to the qkv matmul
# project_out = not (heads == 1 and dim_head == dim) -> True here.


def attention_kernel(x_ref, wqkv_ref, wout_ref, bout_ref, o_ref):
    """Single grid step handles the whole (tiny) problem.

    x_ref:    (B*N, DIM)        VMEM   batch and sequence folded into sublanes
    wqkv_ref: (DIM, 3*INNER)    VMEM   (pre-transposed: y = x @ Wqkv)
    wout_ref: (INNER, DIM)      VMEM   (pre-transposed: y = x @ Wout + b)
    bout_ref: (1, DIM)          VMEM
    o_ref:    (B, DIM)          VMEM   mean over sequence of projected output
    """
    x = x_ref[...]                                                       # (S, DIM)

    # One qkv projection over all batch*sequence rows (16 sublanes, 1 MXU matmul).
    qkv = jnp.dot(x, wqkv_ref[...], preferred_element_type=jnp.float32)  # (S, 3*INNER)

    # Scale q once (N*DIM_HEAD multiplies) instead of every per-head (N,N) dots.
    q = qkv[:, 0 * INNER:1 * INNER] * SCALE
    k = qkv[:, 1 * INNER:2 * INNER]
    v = qkv[:, 2 * INNER:3 * INNER]

    # 'b n (h d) -> (h b) n d': head-major leading batch so attention runs as
    # batched einsums on the MXU (static slices + leading-axis concat only).
    def split_heads(t):
        return jnp.concatenate(
            [t[:, h * DIM_HEAD:(h + 1) * DIM_HEAD].reshape(B, N, DIM_HEAD)
             for h in range(HEADS)],
            axis=0)                                                      # (H*B, N, D_H)

    qg = split_heads(q)
    kg = split_heads(k)
    vg = split_heads(v)

    # Batched scaled dot-product attention over all (head, batch) pairs at once.
    dots = jnp.einsum('gnd,gmd->gnm', qg, kg,
                      preferred_element_type=jnp.float32)                # (H*B, N, N)
    m = jnp.max(dots, axis=-1, keepdims=True)
    e = jnp.exp(dots - m)
    denom = jnp.sum(e, axis=-1, keepdims=True)
    attn = e * pl.reciprocal(denom, approx=True)                         # EUP slot
    outg = jnp.einsum('gnm,gmd->gnd', attn, vg,
                      preferred_element_type=jnp.float32)                # (H*B, N, D_H)

    # mean over the sequence BEFORE the (linear) output projection — exact by
    # linearity (dropout p=0.0 is the identity); shrinks the projection by N.
    mean_g = jnp.mean(outg, axis=1)                                      # (H*B, D_H)

    # '(h b) d -> b (h d)' recombination, then one projection matmul + bias.
    mean_b = jnp.concatenate(
        [mean_g[h * B:(h + 1) * B, :] for h in range(HEADS)], axis=1)    # (B, INNER)
    proj = jnp.dot(mean_b, wout_ref[...],
                   preferred_element_type=jnp.float32) + bout_ref[...]   # (B, DIM)

    o_ref[...] = proj


def attention_forward(x, w_qkv, w_out, b_out):
    """x: (B, N, DIM) -> (B, DIM)."""
    x_flat = x.reshape(B * N, DIM)       # free in the wrapper (plain XLA reshape)
    return pl.pallas_call(
        attention_kernel,
        out_shape=jax.ShapeDtypeStruct((B, DIM), jnp.float32),
        grid=(1,),                        # single step: no per-step overhead, weights DMA'd once
        in_specs=[
            pl.BlockSpec((S, DIM), lambda i: (0, 0)),
            pl.BlockSpec((DIM, 3 * INNER), lambda i: (0, 0)),
            pl.BlockSpec((INNER, DIM), lambda i: (0, 0)),
            pl.BlockSpec((1, DIM), lambda i: (0, 0)),
        ],
        out_specs=pl.BlockSpec((B, DIM), lambda i: (0, 0)),
        compiler_params=pltpu.CompilerParams(
            dimension_semantics=("arbitrary",)),
    )(x_flat, w_qkv, w_out, b_out)


def attention_reference(x, w_qkv, w_out, b_out):
    """Plain-JAX reference mirroring the PyTorch forward."""
    qkv = jnp.einsum('bnd,de->bne', x, w_qkv)
    q, k, v = jnp.split(qkv, 3, axis=-1)

    def to_heads(t):  # 'b n (h d) -> b h n d'
        b, n, _ = t.shape
        return t.reshape(b, n, HEADS, DIM_HEAD).transpose(0, 2, 1, 3)

    q, k, v = map(to_heads, (q, k, v))
    dots = jnp.einsum('bhid,bhjd->bhij', q, k) * SCALE
    attn = jax.nn.softmax(dots, axis=-1)
    out = jnp.einsum('bhij,bhjd->bhid', attn, v)
    out = out.transpose(0, 2, 1, 3).reshape(x.shape[0], x.shape[1], INNER)
    proj = jnp.einsum('bne,ed->bnd', out, w_out) + b_out[0]
    return proj.mean(axis=1)


if __name__ == "__main__":
    key = jax.random.PRNGKey(0)
    kx, kq, kw, kb = jax.random.split(key, 4)

    x = jax.random.normal(kx, (B, N, DIM), dtype=jnp.float32)
    # Parameters stored pre-transposed so y = x @ W (shapes from nn.Linear).
    w_qkv = jax.random.normal(kq, (DIM, 3 * INNER), dtype=jnp.float32) * (DIM ** -0.5)
    w_out = jax.random.normal(kw, (INNER, DIM), dtype=jnp.float32) * (INNER ** -0.5)
    b_out = jax.random.normal(kb, (1, DIM), dtype=jnp.float32) * 0.01

    y = attention_forward(x, w_qkv, w_out, b_out)
    jax.block_until_ready(y)

    y_ref = attention_reference(x, w_qkv, w_out, b_out)
    assert y.shape == (B, DIM)
    # Tolerance slightly relaxed because the softmax normalization uses the EUP
    # approximate reciprocal (pl.reciprocal(approx=True)).
    assert jnp.allclose(y, y_ref, atol=2e-3, rtol=2e-3), "mismatch vs reference"

    print("KERNEL_OK")
</pallas_src>

<mosaic_0001>
module attributes {stable_mosaic.version = 11 : i64} {
  func.func @attention_kernel(%arg0: i32, %arg1: memref<16x32xf32, #tpu.memory_space<vmem>>, %arg2: memref<32x96xf32, #tpu.memory_space<vmem>>, %arg3: memref<32x32xf32, #tpu.memory_space<vmem>>, %arg4: memref<1x32xf32, #tpu.memory_space<vmem>>, %arg5: memref<2x32xf32, #tpu.memory_space<vmem>>) attributes {dimension_semantics = [#tpu.dimension_semantics<arbitrary>], iteration_bounds = array<i64: 1>, scalar_prefetch = 0 : i64, scratch_operands = 0 : i64, tpu.core_type = #tpu.core_type<tc>, window_params = [{pipeline_mode = #tpu.pipeline_mode<synchronous>, transform_indices = @transform_0, window_bounds = array<i64: 16, 32>}, {pipeline_mode = #tpu.pipeline_mode<synchronous>, transform_indices = @transform_1, window_bounds = array<i64: 32, 96>}, {pipeline_mode = #tpu.pipeline_mode<synchronous>, transform_indices = @transform_2, window_bounds = array<i64: 32, 32>}, {pipeline_mode = #tpu.pipeline_mode<synchronous>, transform_indices = @transform_3, window_bounds = array<i64: 1, 32>}, {pipeline_mode = #tpu.pipeline_mode<synchronous>, transform_indices = @transform_4, window_bounds = array<i64: 2, 32>}]} {
    %c0 = arith.constant 0 : index
    %c0_0 = arith.constant 0 : index
    %0 = vector.load %arg1[%c0, %c0_0] : memref<16x32xf32, #tpu.memory_space<vmem>>, vector<16x32xf32>
    %c0_1 = arith.constant 0 : index
    %c0_2 = arith.constant 0 : index
    %1 = vector.load %arg2[%c0_1, %c0_2] : memref<32x96xf32, #tpu.memory_space<vmem>>, vector<32x96xf32>
    %cst = arith.constant dense<0.000000e+00> : vector<16x96xf32>
    %2 = tpu.matmul %0, %1, %cst {dimension_numbers = #tpu.dot_dimension_numbers<[1], [0], [0], [1], [0, 0, 1, 1], [], []>} : vector<16x32xf32>, vector<32x96xf32>, vector<16x96xf32> -> vector<16x96xf32>
    %3 = vector.extract_strided_slice %2 {offsets = [0, 0], sizes = [16, 32], strides = [1, 1]} : vector<16x96xf32> to vector<16x32xf32>
    %cst_3 = arith.constant 0.353553385 : f32
    %4 = vector.broadcast %cst_3 : f32 to vector<16x32xf32>
    %5 = arith.mulf %3, %4 : vector<16x32xf32>
    %6 = vector.extract_strided_slice %2 {offsets = [0, 32], sizes = [16, 32], strides = [1, 1]} : vector<16x96xf32> to vector<16x32xf32>
    %7 = vector.extract_strided_slice %2 {offsets = [0, 64], sizes = [16, 32], strides = [1, 1]} : vector<16x96xf32> to vector<16x32xf32>
    %8 = vector.extract_strided_slice %5 {offsets = [0, 0], sizes = [16, 8], strides = [1, 1]} : vector<16x32xf32> to vector<16x8xf32>
    %9 = vector.shape_cast %8 : vector<16x8xf32> to vector<2x8x8xf32>
    %10 = vector.extract_strided_slice %5 {offsets = [0, 8], sizes = [16, 8], strides = [1, 1]} : vector<16x32xf32> to vector<16x8xf32>
    %11 = vector.shape_cast %10 : vector<16x8xf32> to vector<2x8x8xf32>
    %12 = vector.extract_strided_slice %5 {offsets = [0, 16], sizes = [16, 8], strides = [1, 1]} : vector<16x32xf32> to vector<16x8xf32>
    %13 = vector.shape_cast %12 : vector<16x8xf32> to vector<2x8x8xf32>
    %14 = vector.extract_strided_slice %5 {offsets = [0, 24], sizes = [16, 8], strides = [1, 1]} : vector<16x32xf32> to vector<16x8xf32>
    %15 = vector.shape_cast %14 : vector<16x8xf32> to vector<2x8x8xf32>
    %16 = tpu.concatenate %9, %11, %13, %15 in 0 : vector<2x8x8xf32>, vector<2x8x8xf32>, vector<2x8x8xf32>, vector<2x8x8xf32> -> vector<8x8x8xf32>
    %17 = vector.extract_strided_slice %6 {offsets = [0, 0], sizes = [16, 8], strides = [1, 1]} : vector<16x32xf32> to vector<16x8xf32>
    %18 = vector.shape_cast %17 : vector<16x8xf32> to vector<2x8x8xf32>
    %19 = vector.extract_strided_slice %6 {offsets = [0, 8], sizes = [16, 8], strides = [1, 1]} : vector<16x32xf32> to vector<16x8xf32>
    %20 = vector.shape_cast %19 : vector<16x8xf32> to vector<2x8x8xf32>
    %21 = vector.extract_strided_slice %6 {offsets = [0, 16], sizes = [16, 8], strides = [1, 1]} : vector<16x32xf32> to vector<16x8xf32>
    %22 = vector.shape_cast %21 : vector<16x8xf32> to vector<2x8x8xf32>
    %23 = vector.extract_strided_slice %6 {offsets = [0, 24], sizes = [16, 8], strides = [1, 1]} : vector<16x32xf32> to vector<16x8xf32>
    %24 = vector.shape_cast %23 : vector<16x8xf32> to vector<2x8x8xf32>
    %25 = tpu.concatenate %18, %20, %22, %24 in 0 : vector<2x8x8xf32>, vector<2x8x8xf32>, vector<2x8x8xf32>, vector<2x8x8xf32> -> vector<8x8x8xf32>
    %26 = vector.extract_strided_slice %7 {offsets = [0, 0], sizes = [16, 8], strides = [1, 1]} : vector<16x32xf32> to vector<16x8xf32>
    %27 = vector.shape_cast %26 : vector<16x8xf32> to vector<2x8x8xf32>
    %28 = vector.extract_strided_slice %7 {offsets = [0, 8], sizes = [16, 8], strides = [1, 1]} : vector<16x32xf32> to vector<16x8xf32>
    %29 = vector.shape_cast %28 : vector<16x8xf32> to vector<2x8x8xf32>
    %30 = vector.extract_strided_slice %7 {offsets = [0, 16], sizes = [16, 8], strides = [1, 1]} : vector<16x32xf32> to vector<16x8xf32>
    %31 = vector.shape_cast %30 : vector<16x8xf32> to vector<2x8x8xf32>
    %32 = vector.extract_strided_slice %7 {offsets = [0, 24], sizes = [16, 8], strides = [1, 1]} : vector<16x32xf32> to vector<16x8xf32>
    %33 = vector.shape_cast %32 : vector<16x8xf32> to vector<2x8x8xf32>
    %34 = tpu.concatenate %27, %29, %31, %33 in 0 : vector<2x8x8xf32>, vector<2x8x8xf32>, vector<2x8x8xf32>, vector<2x8x8xf32> -> vector<8x8x8xf32>
    "tpu.trace_start"() <{level = 10 : i32, message = "gnd,gmd->gnm"}> : () -> ()
    %cst_4 = arith.constant dense<0.000000e+00> : vector<8x8x8xf32>
    %35 = tpu.matmul %16, %25, %cst_4 {dimension_numbers = #tpu.dot_dimension_numbers<[2], [2], [1], [1], [0, 0, 0, 1, 1, 1], [0], [0]>} : vector<8x8x8xf32>, vector<8x8x8xf32>, vector<8x8x8xf32> -> vector<8x8x8xf32>
    "tpu.trace_stop"() : () -> ()
    %cst_5 = arith.constant dense<0xFF800000> : vector<8x8xf32>
    %36 = vector.multi_reduction <maximumf>, %35, %cst_5 [2] : vector<8x8x8xf32> to vector<8x8xf32>
    %37 = vector.shape_cast %36 : vector<8x8xf32> to vector<8x8x1xf32>
    %38 = vector.broadcast %37 : vector<8x8x1xf32> to vector<8x8x8xf32>
    %39 = arith.subf %35, %38 : vector<8x8x8xf32>
    %40 = math.exp %39 : vector<8x8x8xf32>
    %cst_6 = arith.constant dense<0.000000e+00> : vector<8x8xf32>
    %41 = vector.multi_reduction <add>, %40, %cst_6 [2] : vector<8x8x8xf32> to vector<8x8xf32>
    %42 = vector.shape_cast %41 : vector<8x8xf32> to vector<8x8x1xf32>
    %43 = tpu.reciprocal %42 {approx = true} : vector<8x8x1xf32> -> vector<8x8x1xf32>
    %44 = vector.broadcast %43 : vector<8x8x1xf32> to vector<8x8x8xf32>
    %45 = arith.mulf %40, %44 : vector<8x8x8xf32>
    "tpu.trace_start"() <{level = 10 : i32, message = "gnm,gmd->gnd"}> : () -> ()
    %cst_7 = arith.constant dense<0.000000e+00> : vector<8x8x8xf32>
    %46 = tpu.matmul %45, %34, %cst_7 {dimension_numbers = #tpu.dot_dimension_numbers<[2], [1], [1], [2], [0, 0, 0, 1, 1, 2], [0], [0]>} : vector<8x8x8xf32>, vector<8x8x8xf32>, vector<8x8x8xf32> -> vector<8x8x8xf32>
    "tpu.trace_stop"() : () -> ()
    %cst_8 = arith.constant dense<0.000000e+00> : vector<8x8xf32>
    %47 = vector.multi_reduction <add>, %46, %cst_8 [1] : vector<8x8x8xf32> to vector<8x8xf32>
    %cst_9 = arith.constant 8.000000e+00 : f32
    %48 = vector.broadcast %cst_9 : f32 to vector<8x8xf32>
    %49 = arith.divf %47, %48 : vector<8x8xf32>
    %50 = vector.extract_strided_slice %49 {offsets = [0, 0], sizes = [2, 8], strides = [1, 1]} : vector<8x8xf32> to vector<2x8xf32>
    %51 = vector.extract_strided_slice %49 {offsets = [2, 0], sizes = [2, 8], strides = [1, 1]} : vector<8x8xf32> to vector<2x8xf32>
    %52 = vector.extract_strided_slice %49 {offsets = [4, 0], sizes = [2, 8], strides = [1, 1]} : vector<8x8xf32> to vector<2x8xf32>
    %53 = vector.extract_strided_slice %49 {offsets = [6, 0], sizes = [2, 8], strides = [1, 1]} : vector<8x8xf32> to vector<2x8xf32>
    %54 = tpu.concatenate %50, %51, %52, %53 in 1 : vector<2x8xf32>, vector<2x8xf32>, vector<2x8xf32>, vector<2x8xf32> -> vector<2x32xf32>
    %c0_10 = arith.constant 0 : index
    %c0_11 = arith.constant 0 : index
    %55 = vector.load %arg3[%c0_10, %c0_11] : memref<32x32xf32, #tpu.memory_space<vmem>>, vector<32x32xf32>
    %cst_12 = arith.constant dense<0.000000e+00> : vector<2x32xf32>
    %56 = tpu.matmul %54, %55, %cst_12 {dimension_numbers = #tpu.dot_dimension_numbers<[1], [0], [0], [1], [0, 0, 1, 1], [], []>} : vector<2x32xf32>, vector<32x32xf32>, vector<2x32xf32> -> vector<2x32xf32>
    %c0_13 = arith.constant 0 : index
    %c0_14 = arith.constant 0 : index
    %57 = vector.load %arg4[%c0_13, %c0_14] : memref<1x32xf32, #tpu.memory_space<vmem>>, vector<1x32xf32>
    %58 = vector.broadcast %57 : vector<1x32xf32> to vector<2x32xf32>
    %59 = arith.addf %56, %58 : vector<2x32xf32>
    %c0_15 = arith.constant 0 : index
    %c0_16 = arith.constant 0 : index
    %60 = vector.load %arg5[%c0_15, %c0_16] : memref<2x32xf32, #tpu.memory_space<vmem>>, vector<2x32xf32>
    tpu.vector_store %arg5[%c0_15, %c0_16], %59 {strides = array<i32>} : memref<2x32xf32, #tpu.memory_space<vmem>>, vector<2x32xf32>,
    return
  }
  func.func @transform_0(%arg0: i32) -> (i32, i32) {
    %c0_i32 = arith.constant 0 : i32
    %c0_i32_0 = arith.constant 0 : i32
    %c0_i32_1 = arith.constant 0 : i32
    return %c0_i32, %c0_i32_0 : i32, i32
  }
  func.func @transform_1(%arg0: i32) -> (i32, i32) {
    %c0_i32 = arith.constant 0 : i32
    %c0_i32_0 = arith.constant 0 : i32
    %c0_i32_1 = arith.constant 0 : i32
    return %c0_i32, %c0_i32_0 : i32, i32
  }
  func.func @transform_2(%arg0: i32) -> (i32, i32) {
    %c0_i32 = arith.constant 0 : i32
    %c0_i32_0 = arith.constant 0 : i32
    %c0_i32_1 = arith.constant 0 : i32
    return %c0_i32, %c0_i32_0 : i32, i32
  }
  func.func @transform_3(%arg0: i32) -> (i32, i32) {
    %c0_i32 = arith.constant 0 : i32
    %c0_i32_0 = arith.constant 0 : i32
    %c0_i32_1 = arith.constant 0 : i32
    return %c0_i32, %c0_i32_0 : i32, i32
  }
  func.func @transform_4(%arg0: i32) -> (i32, i32) {
    %c0_i32 = arith.constant 0 : i32
    %c0_i32_0 = arith.constant 0 : i32
    %c0_i32_1 = arith.constant 0 : i32
    return %c0_i32, %c0_i32_0 : i32, i32
  }
}

</mosaic_0001>

<bundles_post_ra>
// kernel: tpu_custom_call.1
= control target key start
LH: loop header
LB: loop body
LE: loop exit
PB: predicated region body
PF: predicated region fallthrough
CT: control target
= control target key end

     0   :  { %9 = vsyncpa [#allocation3], 0  ;;  %s2235_s0 = inlined_call_operand.hbm [shape: f32[16,32], index: 0, kind: input, shape index: {}]   ;;  %s2236_s1 = inlined_call_operand.hbm [shape: f32[32,96], index: 1, kind: input, shape index: {}]   ;;  %s2237_s2 = inlined_call_operand.hbm [shape: f32[32,32], index: 2, kind: input, shape index: {}]   ;;  %s2238_s3 = inlined_call_operand.vmem [shape: f32[1,32], index: 3, kind: input, shape index: {}]   ;;  %s2239_s4 = inlined_call_operand.hbm [shape: f32[2,32], index: 4, kind: output, shape index: {}]  }
   0x1   :  { %10 = vsyncpa [#allocation6], 0 }
   0x2   :  { %11 = vsyncpa [#allocation4], 0  ;;  %s1983_s15 = smov [#allocation5]   ;;  %s1984_s17 = smov [#allocation2]  }
   0x3   :  { %s29_s16 = sshll.u32 %s1983_s15, 4  ;;  %s17_s18 = sshll.u32 %s1984_s17, 4  ;;  %s30_s16 = int_to_ptr.vmem [resolvable:$true] %s29_s16  ;;  %s18_s18 = int_to_ptr.vmem [resolvable:$true] %s17_s18 }
   0x4   :  { %s1905_s19 = scalar_lea.vmem %s30_s16, 512  ;;  %p1910_p1 = scmp.lt.s32.totalorder %s30_s16, %s30_s16 }
   0x5   :  { %p1906_p0 = scmp.ne.s32.totalorder %s30_s16, %s1905_s19  ;;  %p1911_p2 = scmp.lt.s32.totalorder %s1905_s19, %s1905_s19 }
   0x7   :  { %p1912_p3 = por %p1911_p2, %p1910_p1 }
   0x9   :  { %p1913_p4 = pnand %p1912_p3, %p1906_p0 }
   0xb   :  { %1916 = shalt.err (!%p1913_p4)
}
   0xc   :  { %s1985_s20 = smov 128   ;;  %s1986_s21 = smov 8  }
   0xd   :  { %35 = dma.hbm_to_vmem [thread:$0]  %s2236_s1, 512, %s30_s16, [#allocation6], %s1985_s20, %s1985_s20, %s1986_s21  }
   0xe   :  { %s1925_s24 = scalar_lea.vmem %s18_s18, 256  ;;  %p1930_p6 = scmp.lt.s32.totalorder %s18_s18, %s18_s18 }
   0xf   :  { %p1926_p5 = scmp.ne.s32.totalorder %s18_s18, %s1925_s24  ;;  %p1931_p7 = scmp.lt.s32.totalorder %s1925_s24, %s1925_s24 }
  0x11   :  { %p1932_p8 = por %p1931_p7, %p1930_p6 }
  0x13   :  { %p1933_p9 = pnand %p1932_p8, %p1926_p5 }
  0x15   :  { %1936 = shalt.err (!%p1933_p9)
}
  0x16   :  { %23 = dma.hbm_to_vmem [thread:$0]  %s2235_s0, 256, %s18_s18, [#allocation3], %s1985_s20, %s1985_s20, %s1986_s21  }
  0x17   :  { %s1987_s27 = smov [#allocation7]  }
  0x18   :  { %s41_s28 = sshll.u32 %s1987_s27, 4  ;;  %s42_s28 = int_to_ptr.vmem [resolvable:$true] %s41_s28 }
  0x19   :  { %s1945_s29 = scalar_lea.vmem %s42_s28, 512  ;;  %p1950_p11 = scmp.lt.s32.totalorder %s42_s28, %s42_s28 }
  0x1a   :  { %p1946_p10 = scmp.ne.s32.totalorder %s42_s28, %s1945_s29  ;;  %p1951_p12 = scmp.lt.s32.totalorder %s1945_s29, %s1945_s29 }
  0x1c   :  { %p1952_p13 = por %p1951_p12, %p1950_p11 }
  0x1e   :  { %p1953_p0 = pnand %p1952_p13, %p1946_p10 }
  0x20   :  { %1956 = shalt.err (!%p1953_p0)
}
  0x21   :  { %47 = dma.hbm_to_vmem [thread:$0]  %s2237_s2, 512, %s42_s28, [#allocation6], %s1985_s20, %s1985_s20, %s1986_s21  }
  0x22   :  { %1977 = dma.done.wait [#allocation3], 256  }
  0x23   :  { %1978 = vsyncadd [#allocation3], 4294967040 }
  0x24   :  { %1979 = dma.done.wait [#allocation6], 1024  }
  0x25   :  { %1980 = vsyncadd [#allocation6], 4294966272  ;;  %vm65_vm0 = vcmask 261120   ;;  %v64_v0 = vld [vmem:[#allocation5 + $0x18] sm:$0xff]  ;;  %v63_v1 = vld [vmem:[#allocation5 + $0x10] sm:$0xff]  ;;  %s1988_s0 = smov 112  }
  0x26   :  { %1748 = vmatprep.subr.mxu0 %v64_v0  ;;  %v59_v2 = vld [vmem:[#allocation2] sm:$0xff]  ;;  %v62_v3 = vld [vmem:[#allocation5 + $0x8] sm:$0xff]  ;;  %v61_v4 = vld [vmem:[#allocation5] sm:$0xff]  ;;  %v1989_v7 = vmov 0.0   ;;  %s1990_s2 = smov 120   ;;  %vm1991_vm1 = vmmov 0  }
  0x27   :  { %1749 = vmatpush3.msra.mxu0 %v64_v0  ;;  %1756 = vmatprep.mubr.msk.f32.mxu0 %vm65_vm0, %v59_v2  ;;  %v60_v5 = vld [vmem:[#allocation2 + $0x8] sm:$0xff]  ;;  %s1992_s5 = smov 104   ;;  %s1993_s6 = smov 96   ;;  %vm179_vm2 = vcmask 64512   ;;  %vm1549_vm3 = vcmask 1041409   ;;  %vm1571_vm4 = vcmask 130048  }
  0x28   :  { %1750 = vmatprep.subr.mxu0 %v63_v1  ;;  %1759 = vmatprep.subr.mxu1 %v1989_v7  ;;  %s1994_s7 = smov 64   ;;  %s1995_s8 = smov 16   ;;  %vm1573_vm5 = vcmask 195584   ;;  %vm1659_vm6 = vcmask 254976  }
  0x29   :  { %1751 = vmatpush3.msra.mxu0 %v63_v1  ;;  %1761 = vmatprep.mubr.msk.f32.mxu1 %vm1991_vm1, %v1989_v7  ;;  %s1996_s9 = smov 24   ;;  %s1997_s12 = smov [#allocation8]  }
  0x2a   :  { %1752 = vmatprep.subr.mxu0 %v62_v3  ;;  %s1667_s13 = sshll.u32 %s1997_s12, 4  ;;  %s1668_s13 = int_to_ptr.vmem [resolvable:$true] %s1667_s13 }
  0x2b   :  { %1753 = vmatpush3.msra.mxu0 %v62_v3  ;;  %s1957_s14 = scalar_lea.vmem %s1668_s13, 32  ;;  %p1962_p2 = scmp.lt.s32.totalorder %s1668_s13, %s1668_s13 }
  0x2c   :  { %1754 = vmatprep.subr.mxu0 %v61_v4  ;;  %p1958_p1 = scmp.ne.s32.totalorder %s1668_s13, %s1957_s14  ;;  %p1963_p3 = scmp.lt.s32.totalorder %s1957_s14, %s1957_s14 }
  0x2d   :  { %1755 = vmatpush3.msra.mxu0 %v61_v4 }
  0x2e   :  { %1757 = vmatmul.mubr.msk.f32.vlgmr.msra.gmra.mxu0 %vm65_vm0, %v60_v5  ;;  %1779 = vmatprep.subr.mxu0 %v1989_v7  ;;  %p1964_p4 = por %p1963_p3, %p1962_p2 }
  0x2f   :  { %1781 = vmatprep.mubr.msk.f32.mxu0 %vm1991_vm1, %v1989_v7 }
  0x30   :  { %p1965_p5 = pnand %p1964_p4, %p1958_p1 }
  0xee   :  { %v2037_v6 = vpop.f32.mrf.mxu0 }
  0xef   :  { %171 = vrot.lane.b32.xlu1 %v2037_v6, %s1988_s0  ;;  %v148_v9 = vmul.f32 0.35355338, %v2037_v6 }
  0xf0   :  { %v2042_v8 = vpop.f32.mrf.mxu0 }
  0xf1   :  { %165 = vrot.lane.b32.xlu0 %v2042_v8, %s1990_s2  ;;  %v147_v10 = vmul.f32 0.35355338, %v2042_v8 }
  0xf3   :  { %169 = vrot.lane.b32.xlu1 %v2042_v8, %s1988_s0 }
  0xf5   :  { %167 = vrot.lane.b32.xlu0 %v2037_v6, %s1990_s2 }
  0xf7   :  { %175 = vrot.lane.b32.xlu1 %v2037_v6, %s1992_s5 }
  0xf9   :  { %173 = vrot.lane.b32.xlu0 %v2042_v8, %s1992_s5 }
  0xfb   :  { %254 = vrot.lane.b32.xlu1 %v2037_v6, %s1993_s6 }
  0xfd   :  { %177 = vrot.lane.b32.xlu0 %v2042_v8, %s1993_s6 }
  0xff   :  { %153 = vrot.lane.b32.xlu1 %v148_v9, %s1990_s2 }
 0x103   :  { %151 = vrot.lane.b32.xlu1 %v147_v10, %s1990_s2 }
 0x161   :  { %v2063_v11 = vpop.permute.xlu1 %171 }
 0x162   :  { %558 = vrot.lane.b32.xlu1 %v2063_v11, %s1993_s6 }
 0x163   :  { %v2067_v12 = vpop.permute.xlu0 %165 }
 0x165   :  { %v2069_v13 = vpop.permute.xlu1 %169 }
 0x166   :  { %157 = vrot.lane.b32.xlu1 %v148_v9, %s1988_s0 }
 0x167   :  { %v2072_v14 = vpop.permute.xlu0 %167 }
 0x168   :  { %406 = vrot.lane.b32.xlu0 %v2072_v14, %s1993_s6 }
 0x169   :  { %v2076_v15 = vpop.permute.xlu1 %175 }
 0x16a   :  { %710 = vrot.lane.b32.xlu1 %v2076_v15, %s1993_s6 }
 0x16b   :  { %v2080_v16 = vpop.permute.xlu0 %173 }
 0x16c   :  { %330 = vrot.lane.b32.xlu0 %v2067_v12, %s1993_s6 }
 0x16d   :  { %v255_v18 = vpop.permute.xlu1 %254 }
 0x16e   :  { %161 = vrot.lane.b32.xlu1 %v148_v9, %s1992_s5 }
 0x16f   :  { %v178_v17 = vpop.permute.xlu0 %177 }
 0x170   :  { %1760 = vmatpush3.xpose.msk.msra.mxu1 %vm179_vm2, %v178_v17  ;;  %155 = vrot.lane.b32.xlu0 %v147_v10, %s1988_s0 }
 0x171   :  { %1764 = vmatprep.subr.mxu1 %v1989_v7  ;;  %v154_v19 = vpop.permute.xlu1 %153 }
 0x173   :  { %1762 = vmatmul.mubr.msk.f32.vlgmr.msra.gmra.mxu1 %vm179_vm2, %v147_v10 }
 0x174   :  { %482 = vrot.lane.b32.xlu0 %v2069_v13, %s1993_s6  ;;  %1765 = vmatpush3.xpose.msk.msra.mxu1 %vm179_vm2, %v255_v18 }
 0x175   :  { %1766 = vmatprep.mubr.msk.f32.mxu1 %vm1991_vm1, %v1989_v7  ;;  %1769 = vmatprep.subr.mxu1 %v1989_v7  ;;  %v152_v20 = vpop.permute.xlu1 %151 }
 0x177   :  { %1767 = vmatmul.mubr.msk.f32.vlgmr.msra.gmra.mxu1 %vm179_vm2, %v148_v9 }
 0x178   :  { %634 = vrot.lane.b32.xlu0 %v2080_v16, %s1993_s6  ;;  %1771 = vmatprep.mubr.msk.f32.mxu1 %vm1991_vm1, %v1989_v7 }
 0x17c   :  { %159 = vrot.lane.b32.xlu0 %v147_v10, %s1992_s5 }
 0x1d4   :  { %v559_v22 = vpop.permute.xlu1 %558 }
 0x1d8   :  { %v158_v24 = vpop.permute.xlu1 %157 }
 0x1da   :  { %v407_v21 = vpop.permute.xlu0 %406 }
 0x1dc   :  { %v711_v27 = vpop.permute.xlu1 %710 }
 0x1de   :  { %v331_v23 = vpop.permute.xlu0 %330 }
 0x1df   :  { %1770 = vmatpush3.xpose.msk.msra.mxu1 %vm179_vm2, %v331_v23 }
 0x1e0   :  { %1774 = vmatprep.subr.mxu1 %v1989_v7  ;;  %v162_v29 = vpop.permute.xlu1 %161 }
 0x1e2   :  { %v156_v25 = vpop.permute.xlu0 %155  ;;  %1772 = vmatmul.mubr.msk.f32.vlgmr.msra.gmra.mxu1 %vm179_vm2, %v152_v20 }
 0x1e3   :  { %1775 = vmatpush3.xpose.msk.msra.mxu1 %vm179_vm2, %v407_v21  ;;  %1776 = vmatprep.mubr.msk.f32.mxu1 %vm1991_vm1, %v1989_v7 }
 0x1e4   :  { %1784 = vmatprep.subr.mxu1 %v1989_v7 }
 0x1e6   :  { %v483_v26 = vpop.permute.xlu0 %482  ;;  %1777 = vmatmul.mubr.msk.f32.vlgmr.msra.gmra.mxu1 %vm179_vm2, %v154_v19 }
 0x1e7   :  { %1780 = vmatpush3.xpose.msk.msra.mxu0 %vm179_vm2, %v483_v26  ;;  %1785 = vmatpush3.xpose.msk.msra.mxu1 %vm179_vm2, %v559_v22 }
 0x1e8   :  { %1786 = vmatprep.mubr.msk.f32.mxu1 %vm1991_vm1, %v1989_v7  ;;  %1789 = vmatprep.subr.mxu0 %v1989_v7 }
 0x1e9   :  { %1794 = vmatprep.subr.mxu1 %v1989_v7 }
 0x1ea   :  { %1782 = vmatmul.mubr.msk.f32.vlgmr.msra.gmra.mxu0 %vm179_vm2, %v156_v25  ;;  %v635_v28 = vpop.permute.xlu0 %634  ;;  %1787 = vmatmul.mubr.msk.f32.vlgmr.msra.gmra.mxu1 %vm179_vm2, %v158_v24 }
 0x1eb   :  { %1790 = vmatpush3.xpose.msk.msra.mxu0 %vm179_vm2, %v635_v28  ;;  %1795 = vmatpush3.xpose.msk.msra.mxu1 %vm179_vm2, %v711_v27 }
 0x1ec   :  { %1796 = vmatprep.mubr.msk.f32.mxu1 %vm1991_vm1, %v1989_v7  ;;  %1791 = vmatprep.mubr.msk.f32.mxu0 %vm1991_vm1, %v1989_v7 }
 0x1ed   :  { %1804 = vmatprep.subr.mxu1 %v1989_v7  ;;  %1799 = vmatprep.subr.mxu0 %v1989_v7 }
 0x1ee   :  { %v160_v30 = vpop.permute.xlu0 %159  ;;  %1797 = vmatmul.mubr.msk.f32.vlgmr.msra.gmra.mxu1 %vm179_vm2, %v162_v29 }
 0x1ef   :  { %1792 = vmatmul.mubr.msk.f32.vlgmr.msra.gmra.mxu0 %vm179_vm2, %v160_v30  ;;  %1806 = vmatprep.mubr.msk.f32.mxu1 %vm1991_vm1, %v1989_v7 }
 0x1f0   :  { %1801 = vmatprep.mubr.msk.f32.mxu0 %vm1991_vm1, %v1989_v7 }
 0x233   :  { %v250_v31 = vpop.f32.mrf.mxu1 }
 0x234   :  { %v786_v32 = vsel %vm179_vm2, %v250_v31, -inf }
 0x235   :  { %787 = vmax.xlane.f32.xlu0 %v786_v32  ;;  %v1763_v33 = vpop.f32.mrf.mxu1 }
 0x237   :  { %v326_v34 = vpop.f32.mrf.mxu1 }
 0x238   :  { %v789_v35 = vsel %vm179_vm2, %v326_v34, -inf }
 0x239   :  { %790 = vmax.xlane.f32.xlu1 %v789_v35  ;;  %v1768_v36 = vpop.f32.mrf.mxu1 }
 0x2a2   :  { %v402_v37 = vpop.f32.mrf.mxu1 }
 0x2a3   :  { %v792_v38 = vsel %vm179_vm2, %v402_v37, -inf }
 0x2a4   :  { %793 = vmax.xlane.f32.xlu0 %v792_v38  ;;  %v1773_v39 = vpop.f32.mrf.mxu1 }
 0x2a6   :  { %v478_v40 = vpop.f32.mrf.mxu1 }
 0x2a7   :  { %v795_v41 = vsel %vm179_vm2, %v478_v40, -inf }
 0x2a8   :  { %796 = vmax.xlane.f32.xlu0 %v795_v41  ;;  %v1778_v42 = vpop.f32.mrf.mxu1 }
 0x2aa   :  { %v554_v43 = vpop.f32.mrf.mxu0  ;;  %v630_v44 = vpop.f32.mrf.mxu1 }
 0x2ab   :  { %v798_v45 = vsel %vm179_vm2, %v554_v43, -inf  ;;  %v801_v46 = vsel %vm179_vm2, %v630_v44, -inf }
 0x2ac   :  { %v1783_v47 = vpop.f32.mrf.mxu0  ;;  %799 = vmax.xlane.f32.xlu1 %v798_v45  ;;  %802 = vmax.xlane.f32.xlu0 %v801_v46  ;;  %v1788_v48 = vpop.f32.mrf.mxu1 }
 0x2ae   :  { %v782_v49 = vpop.f32.mrf.mxu1 }
 0x2af   :  { %v706_v50 = vpop.f32.mrf.mxu0  ;;  %v807_v51 = vsel %vm179_vm2, %v782_v49, -inf }
 0x2b0   :  { %808 = vmax.xlane.f32.xlu0 %v807_v51  ;;  %v1798_v52 = vpop.f32.mrf.mxu1  ;;  %v804_v53 = vsel %vm179_vm2, %v706_v50, -inf }
 0x2b1   :  { %v1793_v54 = vpop.f32.mrf.mxu0  ;;  %805 = vmax.xlane.f32.xlu1 %v804_v53 }
 0x2be   :  { %v788_v58 = vpop.xlane.xlu0 %787 }
 0x2bf   :  { %v810_v59 = vsub.f32 %v250_v31, %v788_v58 }
 0x2c1   :  { %v818_v60 = vmul.f32 1.442695, %v810_v59 }
 0x2c2   :  { %874 = vrot.lane.b32.xlu1 %v2042_v8, %s1994_s7  ;;  %v791_v55 = vpop.xlane.xlu1 %790 }
 0x2c3   :  { %v811_v56 = vsub.f32 %v326_v34, %v791_v55 }
 0x2c5   :  { %v820_v57 = vmul.f32 1.442695, %v811_v56 }
 0x2c6   :  { %1026 = vrot.lane.b32.xlu1 %v2067_v12, %s1994_s7  ;;  %950 = vrot.lane.b32.xlu0 %v2037_v6, %s1994_s7 }
 0x2c7   :  { %1865 = vpow2.f32 %v820_v57 }
 0x2c8   :  { %1867 = vpow2.f32 %v818_v60 }
 0x2ca   :  { %1102 = vrot.lane.b32.xlu1 %v2072_v14, %s1994_s7  ;;  %1178 = vrot.lane.b32.xlu0 %v2069_v13, %s1994_s7 }
 0x2ce   :  { %1254 = vrot.lane.b32.xlu1 %v2063_v11, %s1994_s7 }
 0x2d4   :  { %v2151_v61 = vpop.eup %1865 }
 0x2d5   :  { %v837_v62 = vsel %vm179_vm2, %v2151_v61, 0.0  ;;  %v2155_v63 = vpop.eup %1867 }
 0x2d6   :  { %v834_v0 = vsel %vm179_vm2, %v2155_v63, 0.0 }
 0x2e9   :  { %838 = vadd.xlane.f32.xlu0 %v837_v62 }
 0x2f2   :  { %835 = vadd.xlane.f32.xlu1 %v834_v0 }
 0x32d   :  { %v794_v1 = vpop.xlane.xlu0 %793 }
 0x32e   :  { %v812_v2 = vsub.f32 %v402_v37, %v794_v1 }
 0x330   :  { %v822_v3 = vmul.f32 1.442695, %v812_v2 }
 0x331   :  { %v797_v4 = vpop.xlane.xlu0 %796 }
 0x332   :  { %1869 = vpow2.f32 %v822_v3  ;;  %v813_v5 = vsub.f32 %v478_v40, %v797_v4 }
 0x334   :  { %v824_v6 = vmul.f32 1.442695, %v813_v5 }
 0x335   :  { %v800_v8 = vpop.xlane.xlu1 %799  ;;  %v803_v9 = vpop.xlane.xlu0 %802 }
 0x336   :  { %1871 = vpow2.f32 %v824_v6  ;;  %v814_v10 = vsub.f32 %v554_v43, %v800_v8  ;;  %v815_v11 = vsub.f32 %v630_v44, %v803_v9 }
 0x338   :  { %v826_v12 = vmul.f32 1.442695, %v814_v10  ;;  %v828_v13 = vmul.f32 1.442695, %v815_v11 }
 0x339   :  { %v809_v14 = vpop.xlane.xlu0 %808 }
 0x33a   :  { %1873 = vpow2.f32 %v826_v12  ;;  %v817_v17 = vsub.f32 %v782_v49, %v809_v14  ;;  %v806_v18 = vpop.xlane.xlu1 %805 }
 0x33b   :  { %1875 = vpow2.f32 %v828_v13  ;;  %v816_v19 = vsub.f32 %v706_v50, %v806_v18 }
 0x33c   :  { %v832_v20 = vmul.f32 1.442695, %v817_v17 }
 0x33d   :  { %v830_v21 = vmul.f32 1.442695, %v816_v19  ;;  %v951_v22 = vpop.permute.xlu0 %950 }
 0x33e   :  { %1877 = vpow2.f32 %v832_v20  ;;  %v875_v23 = vpop.permute.xlu1 %874  ;;  %1805 = vmatpush3.msra.mxu1 %v951_v22 }
 0x33f   :  { %v1870_v24 = vpop.eup %1869  ;;  %1879 = vpow2.f32 %v830_v21  ;;  %1800 = vmatpush3.msra.mxu0 %v875_v23  ;;  %1814 = vmatprep.subr.mxu1 %v1989_v7 }
 0x340   :  { %v840_v25 = vsel %vm179_vm2, %v1870_v24, 0.0  ;;  %1809 = vmatprep.subr.mxu0 %v1989_v7 }
 0x341   :  { %841 = vadd.xlane.f32.xlu1 %v840_v25  ;;  %v1179_v37 = vpop.permute.xlu0 %1178 }
 0x342   :  { %v1027_v36 = vpop.permute.xlu1 %1026 }
 0x343   :  { %v1872_v26 = vpop.eup %1871 }
 0x344   :  { %v843_v27 = vsel %vm179_vm2, %v1872_v26, 0.0 }
 0x345   :  { %844 = vadd.xlane.f32.xlu0 %v843_v27 }
 0x346   :  { %v1103_v38 = vpop.permute.xlu1 %1102 }
 0x347   :  { %v1874_v28 = vpop.eup %1873 }
 0x348   :  { %v1876_v29 = vpop.eup %1875  ;;  %v846_v30 = vsel %vm179_vm2, %v1874_v28, 0.0 }
 0x349   :  { %847 = vadd.xlane.f32.xlu1 %v846_v30  ;;  %v849_v31 = vsel %vm179_vm2, %v1876_v29, 0.0 }
 0x34a   :  { %850 = vadd.xlane.f32.xlu0 %v849_v31  ;;  %v1255_v40 = vpop.permute.xlu1 %1254 }
 0x34b   :  { %v2165_v32 = vpop.eup %1877 }
 0x34c   :  { %v2167_v33 = vpop.eup %1879  ;;  %v855_v34 = vsel %vm179_vm2, %v2165_v32, 0.0 }
 0x34d   :  { %v852_v35 = vsel %vm179_vm2, %v2167_v33, 0.0 }
 0x34e   :  { %856 = vadd.xlane.f32.xlu0 %v855_v34  ;;  %853 = vadd.xlane.f32.xlu1 %v852_v35 }
 0x35f   :  { %1406 = vrot.lane.b32.xlu1 %v2076_v15, %s1994_s7 }
 0x364   :  { %1330 = vrot.lane.b32.xlu0 %v2080_v16, %s1994_s7 }
 0x372   :  { %v839_v39 = vpop.xlane.xlu0 %838 }
 0x373   :  { %1881 = vrcp.f32 %v839_v39 }
 0x37b   :  { %v836_v41 = vpop.xlane.xlu1 %835 }
 0x37c   :  { %1883 = vrcp.f32 %v836_v41 }
 0x380   :  { %v1882_v42 = vpop.eup %1881 }
 0x381   :  { %v867_v43 = vmul.f32 %v1882_v42, %v2151_v61 }
 0x383   :  { %1807 = vmatmul.mubr.msk.f32.vlgmr.msra.gmra.mxu1 %vm179_vm2, %v867_v43 }
 0x384   :  { %1815 = vmatpush3.msra.mxu1 %v1103_v38  ;;  %1816 = vmatprep.mubr.msk.f32.mxu1 %vm1991_vm1, %v1989_v7 }
 0x385   :  { %1824 = vmatprep.subr.mxu1 %v1989_v7 }
 0x389   :  { %v1884_v15 = vpop.eup %1883 }
 0x38a   :  { %v866_v16 = vmul.f32 %v1884_v15, %v2155_v63 }
 0x38c   :  { %1802 = vmatmul.mubr.msk.f32.vlgmr.msra.gmra.mxu0 %vm179_vm2, %v866_v16 }
 0x38d   :  { %1810 = vmatpush3.msra.mxu0 %v1027_v36  ;;  %1811 = vmatprep.mubr.msk.f32.mxu0 %vm1991_vm1, %v1989_v7 }
 0x38e   :  { %1819 = vmatprep.subr.mxu0 %v1989_v7 }
 0x3ca   :  { %v842_v44 = vpop.xlane.xlu1 %841 }
 0x3cb   :  { %1885 = vrcp.f32 %v842_v44 }
 0x3ce   :  { %v845_v45 = vpop.xlane.xlu0 %844 }
 0x3cf   :  { %1887 = vrcp.f32 %v845_v45 }
 0x3d2   :  { %v848_v46 = vpop.xlane.xlu1 %847 }
 0x3d3   :  { %1889 = vrcp.f32 %v848_v46  ;;  %v851_v47 = vpop.xlane.xlu0 %850 }
 0x3d4   :  { %1891 = vrcp.f32 %v851_v47 }
 0x3d7   :  { %v857_v48 = vpop.xlane.xlu0 %856  ;;  %v854_v49 = vpop.xlane.xlu1 %853 }
 0x3d8   :  { %v1886_v50 = vpop.eup %1885  ;;  %1893 = vrcp.f32 %v857_v48 }
 0x3d9   :  { %1895 = vrcp.f32 %v854_v49  ;;  %v868_v51 = vmul.f32 %v1886_v50, %v1870_v24  ;;  %v1577_v49 = vld [vmem:[#allocation7 + $0x10] sm:$0xff]  ;;  %v1576_v50 = vld [vmem:[#allocation7 + $0x8] sm:$0xff] }
 0x3db   :  { %1812 = vmatmul.mubr.msk.f32.vlgmr.msra.gmra.mxu0 %vm179_vm2, %v868_v51  ;;  %v1331_v58 = vpop.permute.xlu0 %1330  ;;  %v1407_v59 = vpop.permute.xlu1 %1406 }
 0x3dc   :  { %v1888_v52 = vpop.eup %1887  ;;  %1820 = vmatpush3.msra.mxu0 %v1179_v37  ;;  %1821 = vmatprep.mubr.msk.f32.mxu0 %vm1991_vm1, %v1989_v7  ;;  %v1578_v37 = vld [vmem:[#allocation7 + $0x18] sm:$0xff] }
 0x3dd   :  { %v869_v53 = vmul.f32 %v1888_v52, %v1872_v26  ;;  %1829 = vmatprep.subr.mxu0 %v1989_v7 }
 0x3df   :  { %1817 = vmatmul.mubr.msk.f32.vlgmr.msra.gmra.mxu1 %vm179_vm2, %v869_v53 }
 0x3e0   :  { %v1890_v54 = vpop.eup %1889  ;;  %1825 = vmatpush3.msra.mxu1 %v1255_v40  ;;  %1826 = vmatprep.mubr.msk.f32.mxu1 %vm1991_vm1, %v1989_v7 }
 0x3e1   :  { %v1892_v55 = vpop.eup %1891  ;;  %1834 = vmatprep.subr.mxu1 %v1989_v7  ;;  %v870_v56 = vmul.f32 %v1890_v54, %v1874_v28 }
 0x3e2   :  { %v871_v57 = vmul.f32 %v1892_v55, %v1876_v29 }
 0x3e3   :  { %1822 = vmatmul.mubr.msk.f32.vlgmr.msra.gmra.mxu0 %vm179_vm2, %v870_v56 }
 0x3e4   :  { %1827 = vmatmul.mubr.msk.f32.vlgmr.msra.gmra.mxu1 %vm179_vm2, %v871_v57  ;;  %1830 = vmatpush3.msra.mxu0 %v1331_v58 }
 0x3e5   :  { %v1894_v60 = vpop.eup %1893  ;;  %1835 = vmatpush3.msra.mxu1 %v1407_v59  ;;  %1836 = vmatprep.mubr.msk.f32.mxu1 %vm1991_vm1, %v1989_v7 }
 0x3e6   :  { %v1896_v61 = vpop.eup %1895  ;;  %1831 = vmatprep.mubr.msk.f32.mxu0 %vm1991_vm1, %v1989_v7  ;;  %v873_v62 = vmul.f32 %v1894_v60, %v2165_v32  ;;  %1839 = vmatprep.subr.mxu0 %v1989_v7 }
 0x3e7   :  { %v872_v63 = vmul.f32 %v1896_v61, %v2167_v33 }
 0x3e8   :  { %1837 = vmatmul.mubr.msk.f32.vlgmr.msra.gmra.mxu1 %vm179_vm2, %v873_v62 }
 0x3e9   :  { %1832 = vmatmul.mubr.msk.f32.vlgmr.msra.gmra.mxu0 %vm179_vm2, %v872_v63 }
 0x3ea   :  { %1847 = vmatprep.mubr.msk.f32.mxu0 %vm1991_vm1, %v1989_v7  ;;  %1840 = vmatpush3.msra.mxu0 %v1578_v37 }
 0x3eb   :  { %1841 = vmatprep.subr.mxu0 %v1989_v7 }
 0x3ec   :  { %1842 = vmatpush3.msra.mxu0 %v1577_v49 }
 0x3ed   :  { %1843 = vmatprep.subr.mxu0 %v1989_v7 }
 0x3ee   :  { %1844 = vmatpush3.msra.mxu0 %v1576_v50 }
 0x3ef   :  { %1845 = vmatprep.subr.mxu0 %v1989_v7 }
 0x443   :  { %v1022_v0 = vpop.f32.mrf.mxu1 }
 0x444   :  { %v1489_v1 = vsel %vm179_vm2, %v1022_v0, 0.0 }
 0x445   :  { %v1490_v2 = vrot.slane %v1489_v1, 4  ;;  %v1808_v3 = vpop.f32.mrf.mxu1 }
 0x447   :  { %v1491_v4 = vadd.f32 %v1490_v2, %v1489_v1 }
 0x449   :  { %v1492_v5 = vrot.slane %v1491_v4, 2 }
 0x44b   :  { %v1493_v9 = vadd.f32 %v1492_v5, %v1491_v4 }
 0x44c   :  { %v946_v6 = vpop.f32.mrf.mxu0 }
 0x44d   :  { %v1482_v8 = vsel %vm179_vm2, %v946_v6, 0.0  ;;  %v1494_v13 = vrot.slane %v1493_v9, 1  ;;  %v1575_v6 = vld [vmem:[#allocation7] sm:$0xff] }
 0x44e   :  { %v1483_v10 = vrot.slane %v1482_v8, 4  ;;  %v1803_v11 = vpop.f32.mrf.mxu0  ;;  %1846 = vmatpush3.msra.mxu0 %v1575_v6 }
 0x44f   :  { %v1495_v18 = vadd.f32 %v1494_v13, %v1493_v9 }
 0x450   :  { %v1484_v12 = vadd.f32 %v1483_v10, %v1482_v8 }
 0x451   :  { %v1540_v21 = vmul.f32 0.125, %v1495_v18 }
 0x452   :  { %v1485_v14 = vrot.slane %v1484_v12, 2 }
 0x454   :  { %v1486_v17 = vadd.f32 %v1485_v14, %v1484_v12 }
 0x456   :  { %v1487_v19 = vrot.slane %v1486_v17, 1 }
 0x458   :  { %v1488_v20 = vadd.f32 %v1487_v19, %v1486_v17 }
 0x45a   :  { %v1539_v22 = vmul.f32 0.125, %v1488_v20 }
 0x45c   :  { %v2211_v23 = vsel %vm1549_vm3, %v1540_v21, %v1539_v22 }
 0x49b   :  { %v1098_v24 = vpop.f32.mrf.mxu0 }
 0x49c   :  { %v1496_v25 = vsel %vm179_vm2, %v1098_v24, 0.0 }
 0x49d   :  { %v1497_v26 = vrot.slane %v1496_v25, 4  ;;  %v1813_v27 = vpop.f32.mrf.mxu0 }
 0x49f   :  { %v1498_v28 = vadd.f32 %v1497_v26, %v1496_v25  ;;  %v1174_v29 = vpop.f32.mrf.mxu1 }
 0x4a0   :  { %v1503_v30 = vsel %vm179_vm2, %v1174_v29, 0.0 }
 0x4a1   :  { %v1499_v31 = vrot.slane %v1498_v28, 2  ;;  %v1504_v32 = vrot.slane %v1503_v30, 4  ;;  %v1818_v33 = vpop.f32.mrf.mxu1 }
 0x4a3   :  { %v1500_v34 = vadd.f32 %v1499_v31, %v1498_v28  ;;  %v1505_v35 = vadd.f32 %v1504_v32, %v1503_v30  ;;  %v1250_v36 = vpop.f32.mrf.mxu0 }
 0x4a4   :  { %v1510_v38 = vsel %vm179_vm2, %v1250_v36, 0.0  ;;  %v1326_v39 = vpop.f32.mrf.mxu1 }
 0x4a5   :  { %v1501_v40 = vrot.slane %v1500_v34, 1  ;;  %v1506_v41 = vrot.slane %v1505_v35, 2  ;;  %v1511_v42 = vrot.slane %v1510_v38, 4  ;;  %v1517_v43 = vsel %vm179_vm2, %v1326_v39, 0.0  ;;  %v1823_v15 = vpop.f32.mrf.mxu0 }
 0x4a6   :  { %v1518_v16 = vrot.slane %v1517_v43, 4  ;;  %v1828_v44 = vpop.f32.mrf.mxu1 }
 0x4a7   :  { %v1507_v45 = vadd.f32 %v1506_v41, %v1505_v35  ;;  %v1512_v46 = vadd.f32 %v1511_v42, %v1510_v38  ;;  %v1502_v55 = vadd.f32 %v1501_v40, %v1500_v34  ;;  %v1703_v34 = vld [vmem:[%s2238_s3] ss:$0 sm:$0xff] }
 0x4a8   :  { %v1519_v47 = vadd.f32 %v1518_v16, %v1517_v43  ;;  %v1478_v48 = vpop.f32.mrf.mxu1 }
 0x4a9   :  { %v1508_v51 = vrot.slane %v1507_v45, 1  ;;  %v1513_v52 = vrot.slane %v1512_v46, 2  ;;  %v1531_v53 = vsel %vm179_vm2, %v1478_v48, 0.0  ;;  %v1402_v54 = vpop.f32.mrf.mxu0  ;;  %v1541_v4 = vmul.f32 0.125, %v1502_v55 }
 0x4aa   :  { %v1520_v56 = vrot.slane %v1519_v47, 2  ;;  %v1532_v57 = vrot.slane %v1531_v53, 4  ;;  %v1524_v58 = vsel %vm179_vm2, %v1402_v54, 0.0  ;;  %v1838_v59 = vpop.f32.mrf.mxu1 }
 0x4ab   :  { %v1514_v60 = vadd.f32 %v1513_v52, %v1512_v46  ;;  %v1525_v61 = vrot.slane %v1524_v58, 4  ;;  %v1833_v62 = vpop.f32.mrf.mxu0  ;;  %v1509_v63 = vadd.f32 %v1508_v51, %v1507_v45 }
 0x4ac   :  { %v1521_v0 = vadd.f32 %v1520_v56, %v1519_v47  ;;  %v1533_v1 = vadd.f32 %v1532_v57, %v1531_v53 }
 0x4ad   :  { %v1515_v2 = vrot.slane %v1514_v60, 1  ;;  %v1526_v3 = vadd.f32 %v1525_v61, %v1524_v58  ;;  %v1542_v5 = vmul.f32 0.125, %v1509_v63 }
 0x4ae   :  { %v1522_v8 = vrot.slane %v1521_v0, 1  ;;  %v1534_v9 = vrot.slane %v1533_v1, 2 }
 0x4af   :  { %v1516_v10 = vadd.f32 %v1515_v2, %v1514_v60  ;;  %v1527_v11 = vrot.slane %v1526_v3, 2  ;;  %v1554_v12 = vsel %vm1549_vm3, %v1542_v5, %v1541_v4 }
 0x4b0   :  { %v1523_v13 = vadd.f32 %v1522_v8, %v1521_v0  ;;  %v1535_v14 = vadd.f32 %v1534_v9, %v1533_v1  ;;  %1555 = vrot.lane.b32.xlu0 %v1554_v12, %s1986_s21 }
 0x4b1   :  { %v1543_v17 = vmul.f32 0.125, %v1516_v10  ;;  %v1528_v18 = vadd.f32 %v1527_v11, %v1526_v3 }
 0x4b2   :  { %v1544_v19 = vmul.f32 0.125, %v1523_v13  ;;  %v1536_v7 = vrot.slane %v1535_v14, 1 }
 0x4b3   :  { %v1529_v20 = vrot.slane %v1528_v18, 1 }
 0x4b4   :  { %v1537_v21 = vadd.f32 %v1536_v7, %v1535_v14  ;;  %v1560_v22 = vsel %vm1549_vm3, %v1544_v19, %v1543_v17 }
 0x4b5   :  { %v1530_v24 = vadd.f32 %v1529_v20, %v1528_v18  ;;  %1561 = vrot.lane.b32.xlu1 %v1560_v22, %s1995_s8 }
 0x4b6   :  { %v1546_v25 = vmul.f32 0.125, %v1537_v21 }
 0x4b7   :  { %v1545_v26 = vmul.f32 0.125, %v1530_v24 }
 0x4b9   :  { %v1566_v27 = vsel %vm1549_vm3, %v1546_v25, %v1545_v26 }
 0x4ba   :  { %1567 = vrot.lane.b32.xlu0 %v1566_v27, %s1996_s9 }
 0x522   :  { %v1556_v28 = vpop.permute.xlu0 %1555 }
 0x523   :  { %v1570_v30 = vsel %vm179_vm2, %v2211_v23, %v1556_v28 }
 0x527   :  { %v1562_v29 = vpop.permute.xlu1 %1561 }
 0x528   :  { %v1572_v31 = vsel %vm1571_vm4, %v1570_v30, %v1562_v29 }
 0x52c   :  { %v1568_v32 = vpop.permute.xlu0 %1567 }
 0x52d   :  { %v1574_v33 = vsel %vm1573_vm5, %v1572_v31, %v1568_v32 }
 0x52e   :  { %1848 = vmatmul.mubr.msk.f32.vlgmr.msra.gmra.mxu0 %vm65_vm0, %v1574_v33 }
 0x5ee   :  { %v1655_v35 = vpop.f32.mrf.mxu0 }
 0x5ef   :  { %v1656_v36 = vadd.f32 %v1703_v34, %v1655_v35 }
 0x5f0   :  { %v1849_v37 = vpop.f32.mrf.mxu0 }
 0x5f1   :  { %1660 = vst.msk [vmem:[#allocation8] sm:$0x3] %vm1659_vm6, %v1656_v36 }
 0x5f2   :  { %1968 = shalt.err (!%p1965_p5)
}
 0x5f3   :  { %1670 = dma.vmem_to_hbm [thread:$0]  %s1668_s13, 32, %s2239_s4, [#allocation4]  }
 0x5f4   :  { %1981 = dma.done.wait [#allocation4], 32  }
 0x5f5   :  { %1982 = vsyncadd [#allocation4], 4294967264 }
 0x5f6   :  { %1674 = vsyncpa [#allocation3], 1 }
 0x5f7   :  { %1675 = vsyncpa [#allocation6], 1 }
 0x5f8   :  { %1676 = vsyncpa [#allocation4], 1 }

</bundles_post_ra>
